<compile_context>
chip_gen: v7x
topology: tpu7x:2x2x1
jax: 0.10.0
libtpu: 0.0.40
codegen_flags: <defaults>
</compile_context>

<pallas_src>
import jax
import jax.numpy as jnp
from jax.experimental import pallas as pl
from jax.experimental.pallas import tpu as pltpu


def _round_up(n, m):
    return ((n + m - 1) // m) * m


# ----------------------------------------------------------------------------
# Fused GLU kernel: one matmul (D -> 2H) + bias + sigmoid gate + product
# ----------------------------------------------------------------------------
def _glu_kernel(x_ref, w_ref, b_ref, out_ref, gated_ref):
    H = out_ref.shape[-1]
    x = x_ref[...]                                              # (tile_rows, D)
    y = jnp.dot(x, w_ref[...],
                preferred_element_type=jnp.float32) + b_ref[...]  # (tile_rows, 2H)
    act = y[:, :H]                                              # activation half
    gated = jax.nn.sigmoid(y[:, H:])                            # gate half (EUP)
    gated_ref[...] = gated.astype(gated_ref.dtype)
    out_ref[...] = (act * gated).astype(out_ref.dtype)


# ----------------------------------------------------------------------------
# Wrapper: GLU.forward  (dropout = identity, eval-mode semantics)
# ----------------------------------------------------------------------------
def glu_forward(params, x):
    # TODO(synk): train-mode dropout (torch RNG) is not implemented; eval/identity semantics.
    *lead, D = x.shape
    W = params["W_T"]                 # (D, 2H)   [Wa^T | Wg^T]
    b = params["b"]                   # (1, 2H)   [ba   | bg  ]
    H = W.shape[1] // 2

    x2 = x.reshape(-1, D)             # keep native dtype — no wrapper cast
    N = x2.shape[0]

    # Row-tile selection: multiples of 8 sublanes, at least 2 grid steps for
    # megacore sharding when possible, capped so double-buffered VMEM stays
    # well inside the default scoped limit on all generations.
    MAX_TILE_ROWS = 4096
    if N < 8:
        tile_rows = N                 # block == full row dim (allowed)
    else:
        tile_rows = max(8, min(MAX_TILE_ROWS, _round_up(pl.cdiv(N, 2), 8)))
    grid = (pl.cdiv(N, tile_rows),)   # partial last block is masked by Pallas

    out, gated = pl.pallas_call(
        _glu_kernel,
        out_shape=(jax.ShapeDtypeStruct((N, H), x.dtype),
                   jax.ShapeDtypeStruct((N, H), x.dtype)),
        grid_spec=pltpu.PrefetchScalarGridSpec(
            num_scalar_prefetch=0,
            grid=grid,
            in_specs=[
                pl.BlockSpec((tile_rows, D), lambda i: (i, 0)),    # x row tile
                pl.BlockSpec((D, 2 * H), lambda i: (0, 0)),        # fused W (resident)
                pl.BlockSpec((1, 2 * H), lambda i: (0, 0)),        # fused bias (resident)
            ],
            out_specs=[
                pl.BlockSpec((tile_rows, H), lambda i: (i, 0)),    # activation * gate
                pl.BlockSpec((tile_rows, H), lambda i: (i, 0)),    # gate
            ],
        ),
        compiler_params=pltpu.CompilerParams(
            dimension_semantics=("parallel",)),                    # rows independent
    )(x2, W, b)

    return out.reshape(*lead, H), gated.reshape(*lead, H)


# ----------------------------------------------------------------------------
# Pure-JAX reference (mirrors the PyTorch forward) and parameter init
# ----------------------------------------------------------------------------
def reference_forward(params, x):
    H = params["W_T"].shape[1] // 2
    y = x @ params["W_T"] + params["b"]
    act = y[..., :H]
    gated = jax.nn.sigmoid(y[..., H:])
    return act * gated, gated


def init_params(key, input_size, hidden_size):
    ka, kba, kg, kbg = jax.random.split(key, 4)
    bound = 1.0 / jnp.sqrt(float(input_size))
    u = lambda k, shape: jax.random.uniform(k, shape, jnp.float32, -bound, bound)
    # Two nn.Linear layers, stored pre-transposed and fused along the output dim.
    wa_t = u(ka, (input_size, hidden_size))
    wg_t = u(kg, (input_size, hidden_size))
    ba = u(kba, (1, hidden_size))
    bg = u(kbg, (1, hidden_size))
    return {
        "W_T": jnp.concatenate([wa_t, wg_t], axis=1),   # (D, 2H)
        "b":   jnp.concatenate([ba, bg], axis=1),       # (1, 2H)
    }


if __name__ == "__main__":
    key = jax.random.PRNGKey(0)
    kx, kp, kx2 = jax.random.split(key, 3)

    B, S, D, H = 2, 8, 32, 128      # input_size=32, hidden_layer_size=128 (lane-dense)
    x = jax.random.normal(kx, (B, S, D), jnp.float32)
    params = init_params(kp, D, H)

    out, gated = glu_forward(params, x)
    jax.block_until_ready((out, gated))

    out_ref, gated_ref = reference_forward(params, x)
    assert out.shape == (B, S, H) and gated.shape == (B, S, H)
    assert jnp.allclose(out, out_ref, atol=1e-5, rtol=1e-5)
    assert jnp.allclose(gated, gated_ref, atol=1e-5, rtol=1e-5)

    # also exercise the partial-last-block path (flattened rows not a multiple of 8)
    x_odd = jax.random.normal(kx2, (3, 5, D), jnp.float32)
    out2, gated2 = glu_forward(params, x_odd)
    jax.block_until_ready((out2, gated2))
    out2_ref, gated2_ref = reference_forward(params, x_odd)
    assert out2.shape == (3, 5, H) and gated2.shape == (3, 5, H)
    assert jnp.allclose(out2, out2_ref, atol=1e-5, rtol=1e-5)
    assert jnp.allclose(gated2, gated2_ref, atol=1e-5, rtol=1e-5)

    print("KERNEL_OK")
</pallas_src>

<mosaic_0001>
module attributes {stable_mosaic.version = 11 : i64} {
  func.func @_glu_kernel(%arg0: i32, %arg1: memref<8x32xf32, #tpu.memory_space<vmem>>, %arg2: memref<32x256xf32, #tpu.memory_space<vmem>>, %arg3: memref<1x256xf32, #tpu.memory_space<vmem>>, %arg4: memref<8x128xf32, #tpu.memory_space<vmem>>, %arg5: memref<8x128xf32, #tpu.memory_space<vmem>>) attributes {dimension_semantics = [#tpu.dimension_semantics<parallel>], iteration_bounds = array<i64: 2>, scalar_prefetch = 0 : i64, scratch_operands = 0 : i64, tpu.core_type = #tpu.core_type<tc>, window_params = [{transform_indices = @transform_0, window_bounds = array<i64: 8, 32>}, {pipeline_mode = #tpu.pipeline_mode<synchronous>, transform_indices = @transform_1, window_bounds = array<i64: 32, 256>}, {pipeline_mode = #tpu.pipeline_mode<synchronous>, transform_indices = @transform_2, window_bounds = array<i64: 1, 256>}, {transform_indices = @transform_3, window_bounds = array<i64: 8, 128>}, {transform_indices = @transform_4, window_bounds = array<i64: 8, 128>}]} {
    %c0 = arith.constant 0 : index
    %c0_0 = arith.constant 0 : index
    %0 = vector.load %arg1[%c0, %c0_0] : memref<8x32xf32, #tpu.memory_space<vmem>>, vector<8x32xf32>
    %c0_1 = arith.constant 0 : index
    %c0_2 = arith.constant 0 : index
    %1 = vector.load %arg2[%c0_1, %c0_2] : memref<32x256xf32, #tpu.memory_space<vmem>>, vector<32x256xf32>
    %cst = arith.constant dense<0.000000e+00> : vector<8x256xf32>
    %2 = tpu.matmul %0, %1, %cst {dimension_numbers = #tpu.dot_dimension_numbers<[1], [0], [0], [1], [0, 0, 1, 1], [], []>} : vector<8x32xf32>, vector<32x256xf32>, vector<8x256xf32> -> vector<8x256xf32>
    %c0_3 = arith.constant 0 : index
    %c0_4 = arith.constant 0 : index
    %3 = vector.load %arg3[%c0_3, %c0_4] : memref<1x256xf32, #tpu.memory_space<vmem>>, vector<1x256xf32>
    %4 = vector.broadcast %3 : vector<1x256xf32> to vector<8x256xf32>
    %5 = arith.addf %2, %4 : vector<8x256xf32>
    %6 = vector.extract_strided_slice %5 {offsets = [0, 0], sizes = [8, 128], strides = [1, 1]} : vector<8x256xf32> to vector<8x128xf32>
    %7 = vector.extract_strided_slice %5 {offsets = [0, 128], sizes = [8, 128], strides = [1, 1]} : vector<8x256xf32> to vector<8x128xf32>
    %8 = arith.negf %7 : vector<8x128xf32>
    %9 = math.exp %8 : vector<8x128xf32>
    %cst_5 = arith.constant 1.000000e+00 : f32
    %10 = vector.broadcast %cst_5 : f32 to vector<8x128xf32>
    %11 = arith.addf %10, %9 : vector<8x128xf32>
    %12 = arith.divf %10, %11 : vector<8x128xf32>
    %c0_6 = arith.constant 0 : index
    %c0_7 = arith.constant 0 : index
    %13 = vector.load %arg5[%c0_6, %c0_7] : memref<8x128xf32, #tpu.memory_space<vmem>>, vector<8x128xf32>
    tpu.vector_store %arg5[%c0_6, %c0_7], %12 {strides = array<i32>} : memref<8x128xf32, #tpu.memory_space<vmem>>, vector<8x128xf32>,
    %14 = arith.mulf %6, %12 : vector<8x128xf32>
    %c0_8 = arith.constant 0 : index
    %c0_9 = arith.constant 0 : index
    %15 = vector.load %arg4[%c0_8, %c0_9] : memref<8x128xf32, #tpu.memory_space<vmem>>, vector<8x128xf32>
    tpu.vector_store %arg4[%c0_8, %c0_9], %14 {strides = array<i32>} : memref<8x128xf32, #tpu.memory_space<vmem>>, vector<8x128xf32>,
    return
  }
  func.func @transform_0(%arg0: i32) -> (i32, i32) {
    %c0_i32 = arith.constant 0 : i32
    %c0_i32_0 = arith.constant 0 : i32
    return %arg0, %c0_i32 : i32, i32
  }
  func.func @transform_1(%arg0: i32) -> (i32, i32) {
    %c0_i32 = arith.constant 0 : i32
    %c0_i32_0 = arith.constant 0 : i32
    %c0_i32_1 = arith.constant 0 : i32
    return %c0_i32, %c0_i32_0 : i32, i32
  }
  func.func @transform_2(%arg0: i32) -> (i32, i32) {
    %c0_i32 = arith.constant 0 : i32
    %c0_i32_0 = arith.constant 0 : i32
    %c0_i32_1 = arith.constant 0 : i32
    return %c0_i32, %c0_i32_0 : i32, i32
  }
  func.func @transform_3(%arg0: i32) -> (i32, i32) {
    %c0_i32 = arith.constant 0 : i32
    %c0_i32_0 = arith.constant 0 : i32
    return %arg0, %c0_i32 : i32, i32
  }
  func.func @transform_4(%arg0: i32) -> (i32, i32) {
    %c0_i32 = arith.constant 0 : i32
    %c0_i32_0 = arith.constant 0 : i32
    return %arg0, %c0_i32 : i32, i32
  }
}

</mosaic_0001>

<bundles_post_ra>
// kernel: tpu_custom_call.1
= control target key start
LH: loop header
LB: loop body
LE: loop exit
PB: predicated region body
PF: predicated region fallthrough
CT: control target
= control target key end

     0   :  { %10 = vsyncpa [#allocation3], 0  ;;  %s1015_s0 = inlined_call_operand.hbm [shape: f32[16,32], index: 0, kind: input, shape index: {}]   ;;  %s1016_s1 = inlined_call_operand.hbm [shape: f32[32,256], index: 1, kind: input, shape index: {}]   ;;  %s1017_s2 = inlined_call_operand.vmem [shape: f32[1,256], index: 2, kind: input, shape index: {}]   ;;  %s1018_s3 = inlined_call_operand.hbm [shape: f32[16,128], index: 3, kind: output, shape index: {0}]   ;;  %s1019_s4 = inlined_call_operand.hbm [shape: f32[16,128], index: 4, kind: output, shape index: {1}]  }
   0x1   :  { %12 = vsyncpa [#allocation3 + $0x1], 0 }
   0x2   :  { %13 = vsyncpa [#allocation6], 0 }
   0x3   :  { %14 = vsyncpa [#allocation4], 0 }
   0x4   :  { %16 = vsyncpa [#allocation4 + $0x1], 0 }
   0x5   :  { %17 = vsyncpa [#allocation9], 0 }
   0x6   :  { %19 = vsyncpa [#allocation9 + $0x1], 0  ;;  %s778_s15 = smov 0   ;;  %s780_s16 = smov 0  }
   0x7   :  { %s782_s17 = smov 0   ;;  %s784_s18 = smov 0  }
   0x8 LB: > { %s799_s19 = sadd.s32 4294967295, %s744_s18   ;;  %s488_s20 = sadd.s32 4294967294, %s744_s18   ;;  %s744_s18 = sphi %s784_s18, %s1039_s18   ;;  %s740_s17 = sphi %s782_s17, %s1038_s17   ;;  %s736_s16 = sphi %s780_s16, %s1037_s16   ;;  %s732_s15 = sphi %s778_s15, %s1036_s15  }
   0x9   : > { %p45_p0 = scmp.ne.s32.totalorder %s736_s16, %s732_s15  ;;  %p1020_p1 = scmp.eq.s32.totalorder %s799_s19, 0 }
   0xa   : > { %p117_p3 = scmp.eq.s32.totalorder %s488_s20, 1  ;;  %p489_p5 = scmp.ge.s32.totalorder %s744_s18, 1 }
   0xb   : > { %p808_p4 = por %p1020_p1, %p45_p0  ;;  %p150_p7 = scmp.lt.s32.totalorder %s744_s18, 3 }
   0xc   : > { %p813_p6 = por %p117_p3, %p45_p0  ;;  %s746_s24 = smov [#allocation5]  }
   0xd   : > { %s1023_s21 = scalar_select %p808_p4, 1, 0 }
   0xe   : > { %s1024_s22 = scalar_select %p813_p6, 1, 0 }
   0xf   : > { %p818_p8 = pnand %p489_p5, %p150_p7  ;;  %s162_s25 = sshll.u32 %s746_s24, 4  ;;  %s822_s25 = int_to_ptr.vmem [resolvable:$true] %s162_s25 }
  0x10   : > { %s834_s27 = sadd.s32 1, %s744_s18   ;;  %s32_s28 = sadd.s32 1, %s740_s17 }
  0x11   : > { %s1025_s23 = scalar_select %p818_p8, 1, 0 }
  0x12   : > { %p525_p9 = pneg %p818_p8  ;;  %s29_s29 = ssub.s32 %s744_s18, %s834_s27 }
  0x13   : > { %s584_s6 = scalar_lea.hbm %s1016_s1, 1024 }
  0x14   : > { %p829_p11 = pnand %p525_p9, %p1020_p1  ;;  %p585_p12 = scmp.ne.s32.totalorder %s1016_s1, %s584_s6 }
  0x15   : > { %p591_p5 = scmp.lt.u32.totalorder %s584_s6, %s1016_s1 }
  0x16   : > { %p586_p13 = pneg %p829_p11 }
  0x18   : > { %p587_p0 = pnand %p586_p13, %p585_p12 }
  0x1a   : > { %p588_p3 = pneg %p587_p0 }
  0x1c   : > { %p593_p7 = pnand %p591_p5, %p588_p3 }
  0x1e   : > { %596 = shalt.err (!%p593_p7)
}
  0x1f   : > { %s597_s11 = scalar_lea.vmem %s822_s25, 1024  ;;  %p605_p2 = scmp.lt.s32.totalorder %s822_s25, %s822_s25 }
  0x20   : > { %p598_p9 = scmp.ne.s32.totalorder %s822_s25, %s597_s11  ;;  %p606_p6 = scmp.lt.s32.totalorder %s597_s11, %s597_s11 }
  0x22   : > { %p600_p10 = pnand %p598_p9, %p586_p13  ;;  %p607_p4 = por %p606_p6, %p605_p2 }
  0x24   : > { %p601_p1 = pneg %p600_p10 }
  0x26   : > { %p608_p8 = pnand %p607_p4, %p601_p1 }
  0x28   : > { %611 = shalt.err (!%p608_p8)
}
  0x29   : > { %s747_s12 = smov 256   ;;  %s748_s13 = smov 16  }
  0x2a   : > { %528 = dma.hbm_to_vmem [thread:$0]  (!%p829_p11), %s1016_s1, 1024, %s822_s25, [#allocation6], %s747_s12, %s747_s12, %s748_s13  }
  0x2b   : > { %p30_p2 = scmp.eq.s32.totalorder %s29_s29, 0  ;;  %p39_p1 = scmp.ne.s32.totalorder %s740_s17, %s736_s16 }
  0x2c   : > { %p40_p4 = scmp.eq.s32.totalorder %s744_s18, 0  ;;  %p541_p6 = scmp.lt.s32.totalorder %s744_s18, 2 }
  0x2d   : > { %s865_s24 = scalar_select %p30_p2, %s740_s17, %s32_s28  }
  0x2e   : > { %p41_p8 = por %p40_p4, %p39_p1  ;;  %p1027_p10 = scmp.eq.s32.totalorder %s799_s19, 1 }
  0x2f   : > { %s179_s5 = sand.u32 1, %s740_s17   ;;  %s493_s6 = sshll.u32 %s744_s18, 7 }
  0x30   : > { %p869_p12 = por %p1027_p10, %p39_p1  ;;  %s492_s7 = sshll.u32 %s179_s5, 3 }
  0x31   : > { %s878_s9 = scalar_lea.hbm %s1015_s0, %s493_s6  ;;  %s183_s25 = scalar_lea.vmem [#allocation2], %s492_s7 }
  0x32   : > { %s190_s28 = sshll.u32 %s183_s25, 4  ;;  %p880_p11 = pnand %p541_p6, %p41_p8  ;;  %s884_s28 = int_to_ptr.vmem [resolvable:$true] %s190_s28 }
  0x33   : > { %s180_s10 = scalar_lea.sflag [#allocation3], %s179_s5  ;;  %s612_s11 = scalar_lea.hbm %s878_s9, 128 }
  0x34   : > { %p613_p13 = scmp.ne.s32.totalorder %s878_s9, %s612_s11  ;;  %p614_p0 = pneg %p880_p11 }
  0x35   : > { %s617_s14 = scalar_lea.hbm %s1015_s0, 256  ;;  %p618_p7 = scmp.lt.u32.totalorder %s878_s9, %s1015_s0 }
  0x36   : > { %p615_p3 = pnand %p614_p0, %p613_p13  ;;  %p619_p9 = scmp.lt.u32.totalorder %s617_s14, %s612_s11 }
  0x37   : > { %p621_p1 = scmp.lt.u32.totalorder %s612_s11, %s878_s9 }
  0x38   : > { %p616_p5 = pneg %p615_p3  ;;  %p620_p2 = por %p619_p9, %p618_p7 }
  0x3a   : > { %p622_p4 = por %p621_p1, %p620_p2 }
  0x3c   : > { %p623_p6 = pnand %p622_p4, %p616_p5 }
  0x3e   : > { %626 = shalt.err (!%p623_p6)
}
  0x3f   : > { %s627_s5 = scalar_lea.vmem %s884_s28, 128  ;;  %s749_s7 = smov [#allocation2]  }
  0x40   : > { %p628_p8 = scmp.ne.s32.totalorder %s884_s28, %s627_s5  ;;  %s632_s26 = sshll.u32 %s749_s7, 4  ;;  %s633_s26 = int_to_ptr.vmem [resolvable:$false] %s632_s26 }
  0x41   : > { %s634_s8 = scalar_lea.vmem %s633_s26, 256  ;;  %p635_p3 = scmp.lt.s32.totalorder %s884_s28, %s633_s26 }
  0x42   : > { %p630_p10 = pnand %p628_p8, %p614_p0  ;;  %p636_p7 = scmp.lt.s32.totalorder %s634_s8, %s627_s5 }
  0x44   : > { %p631_p13 = pneg %p630_p10  ;;  %p637_p9 = por %p636_p7, %p635_p3 }
  0x46   : > { %p638_p2 = pnand %p637_p9, %p631_p13 }
  0x48   : > { %641 = shalt.err (!%p638_p2)
}
  0x49   : > { %532 = dma.hbm_to_vmem [thread:$0]  (!%p880_p11), %s878_s9, 128, %s884_s28, %s180_s10  }
  0x4a   : > { %p1030_p5 = scmp.ne.s32.totalorder %s1025_s23, 0 }
  0x4b   : > { %s914_s25 = sand.u32 (!%p1030_p5), 1, %s736_s16   ;;  %p1031_p0 = scmp.ne.s32.totalorder (!%p1030_p5), %s1023_s21, 0 }
  0x4c   : > { %199 = sbr.rel (%p1030_p5) target bundleno = 376 (0x178), region = 32  ;;  %s917_s11 = sshll.u32 (!%p1030_p5), %s914_s25, 3 }
  0x4d   : > { %s202_s12 = scalar_lea.sflag (!%p1030_p5), [#allocation3], %s914_s25  ;;  %s205_s13 = scalar_lea.vmem (!%p1030_p5), [#allocation2], %s917_s11 }
  0x53   : > { %715 = dma.done.wait (%p1031_p0), %s202_s12, 128  }
  0x54   : > { %717 = vsyncadd (%p1031_p0), %s202_s12, 4294967168  ;;  %p1032_p11 = scmp.eq.s32.totalorder %s799_s19, 0 }
  0x56   : > { %719 = dma.done.wait (%p1032_p11), [#allocation6], 1024   ;;  %p1033_p1 = pmov %p1032_p11 }
  0x57   : > { %v750_v0 = vmov 0.0   ;;  %v241_v1 = vld [vmem:[#allocation5 + $0x8] sm:$0xff]  ;;  %v243_v2 = vld [vmem:[#allocation5 + $0x18] sm:$0xff]  ;;  %v240_v3 = vld [vmem:[#allocation5] sm:$0xff]  ;;  %vm260_vm0 = vcmask 261120   ;;  %v250_v14 = vlaneseq  ;;  %s503_s9 = sshll.u32 %s799_s19, 7 }
  0x58   : > { %721 = vsyncadd (%p1033_p1), [#allocation6], 4294966272  ;;  %328 = vmatprep.mubr.f32.mxu0 %v750_v0  ;;  %v507_v4 = vpack.c.bf16 %v243_v2, %v241_v1  ;;  %v242_v5 = vld [vmem:[#allocation5 + $0x10] sm:$0xff]  ;;  %v245_v6 = vld [vmem:[#allocation5 + $0x28] sm:$0xff]  ;;  %s238_s28 = scalar_lea.vmem [#allocation8], %s917_s11  ;;  %s231_s10 = scalar_lea.vmem [#allocation7], %s917_s11 }
  0x59   : > { %v247_v7 = vld [vmem:[#allocation5 + $0x38] sm:$0xff]  ;;  %v509_v8 = vpack.c.bf16 %v242_v5, %v240_v3  ;;  %v244_v10 = vld [vmem:[#allocation5 + $0x20] sm:$0xff]  ;;  %v246_v11 = vld [vmem:[#allocation5 + $0x30] sm:$0xff]  ;;  %v251_v15 = vshrl.u32 %v250_v14, 7  ;;  %s376_s29 = sshll.u32 %s238_s28, 4  ;;  %s363_s14 = sshll.u32 %s231_s10, 4  ;;  %s942_s29 = int_to_ptr.vmem [resolvable:$true] %s376_s29  ;;  %s949_s14 = int_to_ptr.vmem [resolvable:$true] %s363_s14 }
  0x5a   : > { %v511_v9 = vpack.c.bf16 %v247_v7, %v245_v6  ;;  %508 = vmatprep.subr.bf16.mxu0 %v507_v4  ;;  %v513_v12 = vpack.c.bf16 %v246_v11, %v244_v10  ;;  %v239_v13 = vld [vmem:[%s205_s13] sm:$0xff]  ;;  %s940_s5 = scalar_lea.hbm %s1019_s4, %s503_s9  ;;  %s947_s26 = scalar_lea.hbm %s1018_s3, %s503_s9 }
  0x5b   : > { %510 = vmatpush1.bf16.msra.mxu0 %v509_v8  ;;  %v256_v16 = vsub.s32 1, %v251_v15  ;;  %v248_v17 = vld [vmem:[%s1017_s2] sm:$0x3]  ;;  %v252_v25 = vsub.s32 0, %v251_v15  ;;  %s350_s8 = scalar_lea.sflag [#allocation9], %s914_s25  ;;  %s642_s12 = scalar_lea.vmem %s942_s29, 128 }
  0x5c   : > { %512 = vmatprep.subr.bf16.mxu0 %v511_v9  ;;  %p643_p4 = scmp.ne.s32.totalorder %s942_s29, %s642_s12  ;;  %s751_s13 = smov [#allocation8]  }
  0x5d   : > { %v257_v18 = vrot.slane %v248_v17, %v256_v16  ;;  %v253_v26 = vrot.slane %v248_v17, %v252_v25  ;;  %s646_s21 = sshll.u32 %s751_s13, 4  ;;  %s647_s21 = int_to_ptr.vmem [resolvable:$false] %s646_s21 }
  0x5e   : > { %p644_p6 = pnand %p643_p4, %p869_p12  ;;  %s648_s23 = scalar_lea.vmem %s647_s21, 256 }
  0x5f   : > { %514 = vmatpush1.bf16.msra.mxu0 %v513_v12  ;;  %p649_p10 = scmp.lt.s32.totalorder %s942_s29, %s647_s21  ;;  %p650_p13 = scmp.lt.s32.totalorder %s648_s23, %s642_s12 }
  0x60   : > { %p645_p8 = pneg %p644_p6 }
  0x61   : > { %p651_p3 = por %p650_p13, %p649_p10 }
  0x62   : > { %499 = vmatmul.mubr.msk.f32.vlgmr.msra.gmra.mrb[0].mxu0 %vm260_vm0, %v239_v13 }
  0x63   : > { %p652_p7 = pnand %p651_p3, %p645_p8 }
 0x135   : > { %v330_v19 = vpop.f32.mrb[0].mxu0 }
 0x136   : > { %v332_v20 = vpop.f32.mrb[1].mxu0  ;;  %v331_v27 = vadd.f32 %v330_v19, %v253_v26 }
 0x137   : > { %v333_v21 = vadd.f32 %v332_v20, %v257_v18 }
 0x139   : > { %v500_v22 = vmul.f32 -1.442695, %v333_v21 }
 0x13b   : > { %580 = vpow2.f32 %v500_v22 }
 0x145   : > { %v581_v23 = vpop.eup %580 }
 0x146   : > { %v338_v24 = vadd.f32 1.0, %v581_v23 }
 0x148   : > { %582 = vrcp.f32 %v338_v24 }
 0x152   : > { %v583_v28 = vpop.eup %582 }
 0x153   : > { %v342_v29 = vmul.f32 %v583_v28, %v331_v27  ;;  %341 = vst [vmem:[%s238_s28] sm:$0xff] %v583_v28 }
 0x154   : > { %655 = shalt.err (!%p652_p7)
}
 0x155   : > { %s656_s9 = scalar_lea.hbm %s940_s5, 128  ;;  %s660_s6 = scalar_lea.hbm %s1019_s4, 256 }
 0x156   : > { %p657_p9 = scmp.ne.s32.totalorder %s940_s5, %s656_s9  ;;  %p661_p0 = scmp.lt.u32.totalorder %s940_s5, %s1019_s4 }
 0x157   : > { %p662_p11 = scmp.lt.u32.totalorder %s660_s6, %s656_s9  ;;  %p664_p4 = scmp.lt.u32.totalorder %s656_s9, %s940_s5 }
 0x158   : > { %p658_p2 = pnand %p657_p9, %p869_p12 }
 0x159   : > { %p663_p1 = por %p662_p11, %p661_p0 }
 0x15a   : > { %p659_p5 = pneg %p658_p2 }
 0x15b   : > { %p665_p6 = por %p664_p4, %p663_p1 }
 0x15d   : > { %p666_p8 = pnand %p665_p6, %p659_p5 }
 0x15f   : > { %669 = shalt.err (!%p666_p8)
}
 0x160   : > { %522 = dma.vmem_to_hbm [thread:$0]  (%p869_p12), %s942_s29, 128, %s940_s5, %s350_s8   ;;  %343 = vst [vmem:[%s231_s10] sm:$0xff] %v342_v29 }
 0x161   : > { %s345_s12 = scalar_lea.sflag [#allocation4], %s914_s25  ;;  %s670_s13 = scalar_lea.vmem %s949_s14, 128 }
 0x162   : > { %p671_p10 = scmp.ne.s32.totalorder %s949_s14, %s670_s13  ;;  %s752_s21 = smov [#allocation7]  }
 0x163   : > { %s674_s23 = sshll.u32 %s752_s21, 4  ;;  %s675_s23 = int_to_ptr.vmem [resolvable:$false] %s674_s23 }
 0x164   : > { %p672_p13 = pnand %p671_p10, %p869_p12  ;;  %s676_s9 = scalar_lea.vmem %s675_s23, 256 }
 0x165   : > { %p677_p7 = scmp.lt.s32.totalorder %s949_s14, %s675_s23  ;;  %p678_p9 = scmp.lt.s32.totalorder %s676_s9, %s670_s13 }
 0x166   : > { %p673_p3 = pneg %p672_p13 }
 0x167   : > { %p679_p2 = por %p678_p9, %p677_p7 }
 0x169   : > { %p680_p5 = pnand %p679_p2, %p673_p3 }
 0x16b   : > { %683 = shalt.err (!%p680_p5)
}
 0x16c   : > { %s684_s25 = scalar_lea.hbm %s947_s26, 128  ;;  %s688_s10 = scalar_lea.hbm %s1018_s3, 256 }
 0x16d   : > { %p685_p0 = scmp.ne.s32.totalorder %s947_s26, %s684_s25  ;;  %p689_p4 = scmp.lt.u32.totalorder %s947_s26, %s1018_s3 }
 0x16e   : > { %p690_p6 = scmp.lt.u32.totalorder %s688_s10, %s684_s25  ;;  %p692_p10 = scmp.lt.u32.totalorder %s684_s25, %s947_s26 }
 0x16f   : > { %p686_p11 = pnand %p685_p0, %p869_p12 }
 0x170   : > { %p691_p8 = por %p690_p6, %p689_p4 }
 0x171   : > { %p687_p1 = pneg %p686_p11 }
 0x172   : > { %p693_p13 = por %p692_p10, %p691_p8 }
 0x174   : > { %p694_p3 = pnand %p693_p13, %p687_p1 }
 0x176   : > { %697 = shalt.err (!%p694_p3)
}
 0x177   : > { %521 = dma.vmem_to_hbm [thread:$0]  (%p869_p12), %s949_s14, 128, %s947_s26, %s345_s12  }
 0x178 PF: > { %s388_s28 = sand.u32 1, %s732_s15   ;;  %p1034_p7 = scmp.ne.s32.totalorder %s1024_s22, 0 }
 0x179   : > { %p1035_p9 = scmp.ge.s32.totalorder %s744_s18, 2  ;;  %s389_s20 = scalar_lea.sflag [#allocation4], %s388_s28 }
 0x17b   : > { %p534_p2 = pnand %p1035_p9, %p1034_p7 }
 0x17d   : > { %723 = dma.done.wait (!%p534_p2), %s389_s20, 128  }
 0x17e   : > { %725 = vsyncadd (!%p534_p2), %s389_s20, 4294967168  ;;  %s398_s6 = scalar_lea.sflag [#allocation9], %s388_s28 }
 0x17f   : > { %727 = dma.done.wait (!%p534_p2), %s398_s6, 128  }
 0x180   : > { %729 = vsyncadd (!%p534_p2), %s398_s6, 4294967168  ;;  %p22_p12 = scmp.ge.s32.totalorder %s834_s27, 4   ;;  %s1036_s15 = smov %s736_s16 }
 0x181   : > { %s1037_s16 = smov %s740_s17  ;;  %s1038_s17 = smov %s865_s24 }
 0x182   : > { %s1039_s18 = smov %s834_s27  ;;  %24 = sbr.rel (!%p22_p12) target bundleno = 8 (0x8), region = 98 }
 0x189   :  { %403 = vsyncpa [#allocation3], 1 }
 0x18a   :  { %405 = vsyncpa [#allocation3 + $0x1], 1 }
 0x18b   :  { %406 = vsyncpa [#allocation6], 1 }
 0x18c   :  { %407 = vsyncpa [#allocation4], 1 }
 0x18d   :  { %409 = vsyncpa [#allocation4 + $0x1], 1 }
 0x18e   :  { %410 = vsyncpa [#allocation9], 1 }
 0x18f   :  { %412 = vsyncpa [#allocation9 + $0x1], 1 }

</bundles_post_ra>
